<compile_context>
chip_gen: v6e
topology: v6e:2x2x1
jax: 0.10.0
libtpu: 0.0.40
codegen_flags: <defaults>
</compile_context>

<pallas_src>
import functools

import jax
import jax.numpy as jnp
import numpy as np
from jax.experimental import pallas as pl
from jax.experimental.pallas import tpu as pltpu


# --------------------------------------------------------------------------
# Fused per-batch kernel
# --------------------------------------------------------------------------
def residual_block_kernel(x_ref, mask_ref, w1_ref, g1_ref, b1_ref,
                          w2_ref, g2_ref, b2_ref, out_ref, taps_ref,
                          *, Wp, HW, eps):
    C = out_ref.shape[1]          # channels
    Ppad = out_ref.shape[2]       # flattened padded spatial, multiple of 128
    KP = taps_ref.shape[0]        # 9*C rounded up to a multiple of 128
    inv_hw = 1.0 / HW

    xv = x_ref[0]                 # (C, Ppad) zero-padded, flattened input
    mask = mask_ref[...]          # (1, Ppad) 1.0 on the HxW interior, else 0

    # 3x3 stencil tap offsets in the flattened (Hp, Wp) grid.
    offsets = tuple(dy * Wp + dx for dy in (-1, 0, 1) for dx in (-1, 0, 1))

    # Zero the K-padding rows once; both convs reuse the same scratch and
    # never touch these rows again (paired zero columns in the weights).
    if KP > 9 * C:
        taps_ref[9 * C:, :] = jnp.zeros((KP - 9 * C, Ppad), jnp.float32)

    def conv3x3(h, w_mat):
        # Build the 9 shifted taps with lane rotations (XLU) into static
        # slices of the VMEM scratch, then one MXU matmul (C,KP)@(KP,Ppad).
        # Roll wrap-around only pollutes ring/tail positions, which the
        # interior mask removes from all statistics and the final crop.
        for k, off in enumerate(offsets):
            shifted = h if off == 0 else pltpu.roll(h, (-off) % Ppad, axis=1)
            taps_ref[k * C:(k + 1) * C, :] = shifted
        return jnp.dot(w_mat, taps_ref[...], preferred_element_type=jnp.float32)

    def instance_norm(y, g, b):
        # Biased variance over the HxW interior only; affine gamma/beta.
        mean = jnp.sum(y * mask, axis=1, keepdims=True) * inv_hw     # (C, 1)
        cent = (y - mean) * mask
        var = jnp.sum(cent * cent, axis=1, keepdims=True) * inv_hw
        return cent * jax.lax.rsqrt(var + eps) * g + b

    # conv1 -> InstanceNorm(affine) -> ReLU ; re-zero the ring so conv2 sees
    # correct zero padding.
    h1 = jnp.maximum(
        instance_norm(conv3x3(xv, w1_ref[...]), g1_ref[...], b1_ref[...]),
        0.0) * mask

    # conv2 -> InstanceNorm(affine)
    h2 = instance_norm(conv3x3(h1, w2_ref[...]), g2_ref[...], b2_ref[...])

    # Residual add; ring / lane-tail positions are cropped by the wrapper.
    out_ref[0] = (xv + h2).astype(out_ref.dtype)


# --------------------------------------------------------------------------
# Forward wrapper (layout glue only: pad ring, flatten spatial, crop back)
# --------------------------------------------------------------------------
def residual_block_forward(x, w1, g1, b1, w2, g2, b2, *, eps=1e-5):
    # x: (N, C, H, W); w1, w2: (C, C, 3, 3); g*, b*: (C,)
    N, C, H, W = x.shape
    Hp, Wp = H + 2, W + 2
    P = Hp * Wp
    Ppad = ((P + 127) // 128) * 128            # lane-dense flattened spatial
    KP = ((9 * C + 127) // 128) * 128          # MXU-friendly contraction size
    HW = H * W

    # Zero-pad the ring, flatten spatial into the lane axis, pad to Ppad lanes.
    xpad = jnp.pad(x, ((0, 0), (0, 0), (1, 1), (1, 1)))
    xflat = jnp.pad(xpad.reshape(N, C, P), ((0, 0), (0, 0), (0, Ppad - P)))

    # Interior-position mask (trace-time constant).
    m = np.zeros((Hp, Wp), np.float32)
    m[1:1 + H, 1:1 + W] = 1.0
    mask = jnp.asarray(np.pad(m.reshape(1, P), ((0, 0), (0, Ppad - P))))

    # (Cout, Cin, 3, 3) -> (Cout, 9*Cin) matching tap order, zero-padded to KP.
    def pack_w(w):
        wm = jnp.transpose(w, (0, 2, 3, 1)).reshape(C, 9 * C)
        return jnp.pad(wm, ((0, 0), (0, KP - 9 * C)))

    wm1, wm2 = pack_w(w1), pack_w(w2)
    g1c, b1c = g1.reshape(C, 1), b1.reshape(C, 1)
    g2c, b2c = g2.reshape(C, 1), b2.reshape(C, 1)

    kernel = functools.partial(residual_block_kernel, Wp=Wp, HW=HW, eps=eps)

    out = pl.pallas_call(
        kernel,
        out_shape=jax.ShapeDtypeStruct((N, C, Ppad), jnp.float32),
        grid_spec=pltpu.PrefetchScalarGridSpec(
            num_scalar_prefetch=0,
            grid=(N,),
            in_specs=[
                pl.BlockSpec((1, C, Ppad), lambda n: (n, 0, 0)),   # x (flat)
                pl.BlockSpec((1, Ppad), lambda n: (0, 0)),         # mask
                pl.BlockSpec((C, KP), lambda n: (0, 0)),           # w1
                pl.BlockSpec((C, 1), lambda n: (0, 0)),            # gamma1
                pl.BlockSpec((C, 1), lambda n: (0, 0)),            # beta1
                pl.BlockSpec((C, KP), lambda n: (0, 0)),           # w2
                pl.BlockSpec((C, 1), lambda n: (0, 0)),            # gamma2
                pl.BlockSpec((C, 1), lambda n: (0, 0)),            # beta2
            ],
            out_specs=pl.BlockSpec((1, C, Ppad), lambda n: (n, 0, 0)),
            scratch_shapes=[pltpu.VMEM((KP, Ppad), jnp.float32)],
        ),
        compiler_params=pltpu.CompilerParams(
            dimension_semantics=("parallel",),
        ),
    )(xflat, mask, wm1, g1c, b1c, wm2, g2c, b2c)

    # Drop the lane tail, un-flatten, crop the padding ring.
    out = out[:, :, :P].reshape(N, C, Hp, Wp)[:, :, 1:1 + H, 1:1 + W]
    return out


# --------------------------------------------------------------------------
# Pure-JAX reference
# --------------------------------------------------------------------------
def ref_forward(x, w1, g1, b1, w2, g2, b2, eps=1e-5):
    def conv(h, w):
        return jax.lax.conv_general_dilated(
            h, w, window_strides=(1, 1), padding=[(1, 1), (1, 1)],
            dimension_numbers=("NCHW", "OIHW", "NCHW"))

    def inorm(h, g, b):
        mu = jnp.mean(h, axis=(2, 3), keepdims=True)
        var = jnp.mean(jnp.square(h - mu), axis=(2, 3), keepdims=True)
        return ((h - mu) * jax.lax.rsqrt(var + eps)
                * g[None, :, None, None] + b[None, :, None, None])

    h = jnp.maximum(inorm(conv(x, w1), g1, b1), 0.0)
    h = inorm(conv(h, w2), g2, b2)
    return x + h


if __name__ == "__main__":
    # ResidualBlock(in_features=16) on a small deterministic example.
    N, C, H, W = 2, 16, 16, 16
    key = jax.random.PRNGKey(0)
    kx, kw1, kw2, kg1, kb1, kg2, kb2 = jax.random.split(key, 7)

    def bf16_exact(a):
        # Keep test data exactly bf16-representable so the MXU path
        # (bf16 multiplies, f32 accumulate) matches the reference tightly.
        return a.astype(jnp.bfloat16).astype(jnp.float32)

    x = bf16_exact(jax.random.normal(kx, (N, C, H, W), jnp.float32))
    w1 = bf16_exact(0.1 * jax.random.normal(kw1, (C, C, 3, 3), jnp.float32))
    w2 = bf16_exact(0.1 * jax.random.normal(kw2, (C, C, 3, 3), jnp.float32))
    g1 = bf16_exact(1.0 + 0.2 * jax.random.normal(kg1, (C,), jnp.float32))
    b1 = bf16_exact(0.1 * jax.random.normal(kb1, (C,), jnp.float32))
    g2 = bf16_exact(1.0 + 0.2 * jax.random.normal(kg2, (C,), jnp.float32))
    b2 = bf16_exact(0.1 * jax.random.normal(kb2, (C,), jnp.float32))

    out = jax.jit(residual_block_forward)(x, w1, g1, b1, w2, g2, b2)
    out = jax.block_until_ready(out)
    assert out.shape == (N, C, H, W), out.shape

    ref = ref_forward(x, w1, g1, b1, w2, g2, b2)
    np.testing.assert_allclose(np.asarray(out), np.asarray(ref),
                               rtol=5e-3, atol=5e-3)
    print("KERNEL_OK")
</pallas_src>

<mosaic_0001>
module attributes {stable_mosaic.version = 11 : i64} {
  func.func @residual_block_kernel(%arg0: i32, %arg1: memref<1x16x384xf32, #tpu.memory_space<vmem>>, %arg2: memref<1x384xf32, #tpu.memory_space<vmem>>, %arg3: memref<16x256xf32, #tpu.memory_space<vmem>>, %arg4: memref<16x1xf32, #tpu.memory_space<vmem>>, %arg5: memref<16x1xf32, #tpu.memory_space<vmem>>, %arg6: memref<16x256xf32, #tpu.memory_space<vmem>>, %arg7: memref<16x1xf32, #tpu.memory_space<vmem>>, %arg8: memref<16x1xf32, #tpu.memory_space<vmem>>, %arg9: memref<1x16x384xf32, #tpu.memory_space<vmem>>, %arg10: memref<256x384xf32, #tpu.memory_space<vmem>>) attributes {dimension_semantics = [#tpu.dimension_semantics<parallel>], iteration_bounds = array<i64: 2>, scalar_prefetch = 0 : i64, scratch_operands = 1 : i64, tpu.core_type = #tpu.core_type<tc>, window_params = [{transform_indices = @transform_0, window_bounds = array<i64: 1, 16, 384>}, {pipeline_mode = #tpu.pipeline_mode<synchronous>, transform_indices = @transform_1, window_bounds = array<i64: 1, 384>}, {pipeline_mode = #tpu.pipeline_mode<synchronous>, transform_indices = @transform_2, window_bounds = array<i64: 16, 256>}, {pipeline_mode = #tpu.pipeline_mode<synchronous>, transform_indices = @transform_3, window_bounds = array<i64: 16, 1>}, {pipeline_mode = #tpu.pipeline_mode<synchronous>, transform_indices = @transform_4, window_bounds = array<i64: 16, 1>}, {pipeline_mode = #tpu.pipeline_mode<synchronous>, transform_indices = @transform_5, window_bounds = array<i64: 16, 256>}, {pipeline_mode = #tpu.pipeline_mode<synchronous>, transform_indices = @transform_6, window_bounds = array<i64: 16, 1>}, {pipeline_mode = #tpu.pipeline_mode<synchronous>, transform_indices = @transform_7, window_bounds = array<i64: 16, 1>}, {transform_indices = @transform_8, window_bounds = array<i64: 1, 16, 384>}]} {
    %c0 = arith.constant 0 : index
    %c0_0 = arith.constant 0 : index
    %c0_1 = arith.constant 0 : index
    %0 = vector.load %arg1[%c0, %c0_0, %c0_1] : memref<1x16x384xf32, #tpu.memory_space<vmem>>, vector<1x16x384xf32>
    %1 = vector.shape_cast %0 : vector<1x16x384xf32> to vector<16x384xf32>
    %c0_2 = arith.constant 0 : index
    %c0_3 = arith.constant 0 : index
    %2 = vector.load %arg2[%c0_2, %c0_3] : memref<1x384xf32, #tpu.memory_space<vmem>>, vector<1x384xf32>
    %cst = arith.constant 0.000000e+00 : f32
    %3 = vector.broadcast %cst : f32 to vector<112x384xf32>
    %c144 = arith.constant 144 : index
    %c0_4 = arith.constant 0 : index
    %4 = vector.load %arg10[%c144, %c0_4] : memref<256x384xf32, #tpu.memory_space<vmem>>, vector<112x384xf32>
    tpu.vector_store %arg10[%c144, %c0_4], %3 {strides = array<i32>} : memref<256x384xf32, #tpu.memory_space<vmem>>, vector<112x384xf32>,
    %c0_5 = arith.constant 0 : index
    %c0_6 = arith.constant 0 : index
    %5 = vector.load %arg3[%c0_5, %c0_6] : memref<16x256xf32, #tpu.memory_space<vmem>>, vector<16x256xf32>
    %c19_i32 = arith.constant 19 : i32
    %6 = tpu.dynamic_rotate %1 by %c19_i32 dim 1 : vector<16x384xf32>, i32 -> vector<16x384xf32>
    %c0_7 = arith.constant 0 : index
    %c0_8 = arith.constant 0 : index
    %7 = vector.load %arg10[%c0_7, %c0_8] : memref<256x384xf32, #tpu.memory_space<vmem>>, vector<16x384xf32>
    tpu.vector_store %arg10[%c0_7, %c0_8], %6 {strides = array<i32>} : memref<256x384xf32, #tpu.memory_space<vmem>>, vector<16x384xf32>,
    %c18_i32 = arith.constant 18 : i32
    %8 = tpu.dynamic_rotate %1 by %c18_i32 dim 1 : vector<16x384xf32>, i32 -> vector<16x384xf32>
    %c16 = arith.constant 16 : index
    %c0_9 = arith.constant 0 : index
    %9 = vector.load %arg10[%c16, %c0_9] : memref<256x384xf32, #tpu.memory_space<vmem>>, vector<16x384xf32>
    tpu.vector_store %arg10[%c16, %c0_9], %8 {strides = array<i32>} : memref<256x384xf32, #tpu.memory_space<vmem>>, vector<16x384xf32>,
    %c17_i32 = arith.constant 17 : i32
    %10 = tpu.dynamic_rotate %1 by %c17_i32 dim 1 : vector<16x384xf32>, i32 -> vector<16x384xf32>
    %c32 = arith.constant 32 : index
    %c0_10 = arith.constant 0 : index
    %11 = vector.load %arg10[%c32, %c0_10] : memref<256x384xf32, #tpu.memory_space<vmem>>, vector<16x384xf32>
    tpu.vector_store %arg10[%c32, %c0_10], %10 {strides = array<i32>} : memref<256x384xf32, #tpu.memory_space<vmem>>, vector<16x384xf32>,
    %c1_i32 = arith.constant 1 : i32
    %12 = tpu.dynamic_rotate %1 by %c1_i32 dim 1 : vector<16x384xf32>, i32 -> vector<16x384xf32>
    %c48 = arith.constant 48 : index
    %c0_11 = arith.constant 0 : index
    %13 = vector.load %arg10[%c48, %c0_11] : memref<256x384xf32, #tpu.memory_space<vmem>>, vector<16x384xf32>
    tpu.vector_store %arg10[%c48, %c0_11], %12 {strides = array<i32>} : memref<256x384xf32, #tpu.memory_space<vmem>>, vector<16x384xf32>,
    %c64 = arith.constant 64 : index
    %c0_12 = arith.constant 0 : index
    %14 = vector.load %arg10[%c64, %c0_12] : memref<256x384xf32, #tpu.memory_space<vmem>>, vector<16x384xf32>
    tpu.vector_store %arg10[%c64, %c0_12], %1 {strides = array<i32>} : memref<256x384xf32, #tpu.memory_space<vmem>>, vector<16x384xf32>,
    %c383_i32 = arith.constant 383 : i32
    %15 = tpu.dynamic_rotate %1 by %c383_i32 dim 1 : vector<16x384xf32>, i32 -> vector<16x384xf32>
    %c80 = arith.constant 80 : index
    %c0_13 = arith.constant 0 : index
    %16 = vector.load %arg10[%c80, %c0_13] : memref<256x384xf32, #tpu.memory_space<vmem>>, vector<16x384xf32>
    tpu.vector_store %arg10[%c80, %c0_13], %15 {strides = array<i32>} : memref<256x384xf32, #tpu.memory_space<vmem>>, vector<16x384xf32>,
    %c367_i32 = arith.constant 367 : i32
    %17 = tpu.dynamic_rotate %1 by %c367_i32 dim 1 : vector<16x384xf32>, i32 -> vector<16x384xf32>
    %c96 = arith.constant 96 : index
    %c0_14 = arith.constant 0 : index
    %18 = vector.load %arg10[%c96, %c0_14] : memref<256x384xf32, #tpu.memory_space<vmem>>, vector<16x384xf32>
    tpu.vector_store %arg10[%c96, %c0_14], %17 {strides = array<i32>} : memref<256x384xf32, #tpu.memory_space<vmem>>, vector<16x384xf32>,
    %c366_i32 = arith.constant 366 : i32
    %19 = tpu.dynamic_rotate %1 by %c366_i32 dim 1 : vector<16x384xf32>, i32 -> vector<16x384xf32>
    %c112 = arith.constant 112 : index
    %c0_15 = arith.constant 0 : index
    %20 = vector.load %arg10[%c112, %c0_15] : memref<256x384xf32, #tpu.memory_space<vmem>>, vector<16x384xf32>
    tpu.vector_store %arg10[%c112, %c0_15], %19 {strides = array<i32>} : memref<256x384xf32, #tpu.memory_space<vmem>>, vector<16x384xf32>,
    %c365_i32 = arith.constant 365 : i32
    %21 = tpu.dynamic_rotate %1 by %c365_i32 dim 1 : vector<16x384xf32>, i32 -> vector<16x384xf32>
    %c128 = arith.constant 128 : index
    %c0_16 = arith.constant 0 : index
    %22 = vector.load %arg10[%c128, %c0_16] : memref<256x384xf32, #tpu.memory_space<vmem>>, vector<16x384xf32>
    tpu.vector_store %arg10[%c128, %c0_16], %21 {strides = array<i32>} : memref<256x384xf32, #tpu.memory_space<vmem>>, vector<16x384xf32>,
    %c0_17 = arith.constant 0 : index
    %c0_18 = arith.constant 0 : index
    %23 = vector.load %arg10[%c0_17, %c0_18] : memref<256x384xf32, #tpu.memory_space<vmem>>, vector<256x384xf32>
    %cst_19 = arith.constant dense<0.000000e+00> : vector<16x384xf32>
    %24 = tpu.matmul %5, %23, %cst_19 {dimension_numbers = #tpu.dot_dimension_numbers<[1], [0], [0], [1], [0, 0, 1, 1], [], []>} : vector<16x256xf32>, vector<256x384xf32>, vector<16x384xf32> -> vector<16x384xf32>
    %c0_20 = arith.constant 0 : index
    %c0_21 = arith.constant 0 : index
    %25 = vector.load %arg4[%c0_20, %c0_21] : memref<16x1xf32, #tpu.memory_space<vmem>>, vector<16x1xf32>
    %c0_22 = arith.constant 0 : index
    %c0_23 = arith.constant 0 : index
    %26 = vector.load %arg5[%c0_22, %c0_23] : memref<16x1xf32, #tpu.memory_space<vmem>>, vector<16x1xf32>
    %27 = vector.broadcast %2 : vector<1x384xf32> to vector<16x384xf32>
    %28 = arith.mulf %24, %27 : vector<16x384xf32>
    %cst_24 = arith.constant dense<0.000000e+00> : vector<16xf32>
    %29 = vector.multi_reduction <add>, %28, %cst_24 [1] : vector<16x384xf32> to vector<16xf32>
    %30 = vector.shape_cast %29 : vector<16xf32> to vector<16x1xf32>
    %cst_25 = arith.constant 3.906250e-03 : f32
    %31 = vector.broadcast %cst_25 : f32 to vector<16x1xf32>
    %32 = arith.mulf %30, %31 : vector<16x1xf32>
    %33 = vector.broadcast %32 : vector<16x1xf32> to vector<16x384xf32>
    %34 = arith.subf %24, %33 : vector<16x384xf32>
    %35 = vector.broadcast %2 : vector<1x384xf32> to vector<16x384xf32>
    %36 = arith.mulf %34, %35 : vector<16x384xf32>
    %37 = arith.mulf %36, %36 : vector<16x384xf32>
    %cst_26 = arith.constant dense<0.000000e+00> : vector<16xf32>
    %38 = vector.multi_reduction <add>, %37, %cst_26 [1] : vector<16x384xf32> to vector<16xf32>
    %39 = vector.shape_cast %38 : vector<16xf32> to vector<16x1xf32>
    %cst_27 = arith.constant 3.906250e-03 : f32
    %40 = vector.broadcast %cst_27 : f32 to vector<16x1xf32>
    %41 = arith.mulf %39, %40 : vector<16x1xf32>
    %cst_28 = arith.constant 9.99999974E-6 : f32
    %42 = vector.broadcast %cst_28 : f32 to vector<16x1xf32>
    %43 = arith.addf %41, %42 : vector<16x1xf32>
    %44 = math.rsqrt %43 : vector<16x1xf32>
    %45 = vector.broadcast %44 : vector<16x1xf32> to vector<16x384xf32>
    %46 = arith.mulf %36, %45 : vector<16x384xf32>
    %47 = vector.broadcast %25 : vector<16x1xf32> to vector<16x384xf32>
    %48 = arith.mulf %46, %47 : vector<16x384xf32>
    %49 = vector.broadcast %26 : vector<16x1xf32> to vector<16x384xf32>
    %50 = arith.addf %48, %49 : vector<16x384xf32>
    %cst_29 = arith.constant 0.000000e+00 : f32
    %51 = vector.broadcast %cst_29 : f32 to vector<16x384xf32>
    %52 = arith.maximumf %50, %51 : vector<16x384xf32>
    %53 = vector.broadcast %2 : vector<1x384xf32> to vector<16x384xf32>
    %54 = arith.mulf %52, %53 : vector<16x384xf32>
    %c0_30 = arith.constant 0 : index
    %c0_31 = arith.constant 0 : index
    %55 = vector.load %arg6[%c0_30, %c0_31] : memref<16x256xf32, #tpu.memory_space<vmem>>, vector<16x256xf32>
    %c19_i32_32 = arith.constant 19 : i32
    %56 = tpu.dynamic_rotate %54 by %c19_i32_32 dim 1 : vector<16x384xf32>, i32 -> vector<16x384xf32>
    %c0_33 = arith.constant 0 : index
    %c0_34 = arith.constant 0 : index
    %57 = vector.load %arg10[%c0_33, %c0_34] : memref<256x384xf32, #tpu.memory_space<vmem>>, vector<16x384xf32>
    tpu.vector_store %arg10[%c0_33, %c0_34], %56 {strides = array<i32>} : memref<256x384xf32, #tpu.memory_space<vmem>>, vector<16x384xf32>,
    %c18_i32_35 = arith.constant 18 : i32
    %58 = tpu.dynamic_rotate %54 by %c18_i32_35 dim 1 : vector<16x384xf32>, i32 -> vector<16x384xf32>
    %c16_36 = arith.constant 16 : index
    %c0_37 = arith.constant 0 : index
    %59 = vector.load %arg10[%c16_36, %c0_37] : memref<256x384xf32, #tpu.memory_space<vmem>>, vector<16x384xf32>
    tpu.vector_store %arg10[%c16_36, %c0_37], %58 {strides = array<i32>} : memref<256x384xf32, #tpu.memory_space<vmem>>, vector<16x384xf32>,
    %c17_i32_38 = arith.constant 17 : i32
    %60 = tpu.dynamic_rotate %54 by %c17_i32_38 dim 1 : vector<16x384xf32>, i32 -> vector<16x384xf32>
    %c32_39 = arith.constant 32 : index
    %c0_40 = arith.constant 0 : index
    %61 = vector.load %arg10[%c32_39, %c0_40] : memref<256x384xf32, #tpu.memory_space<vmem>>, vector<16x384xf32>
    tpu.vector_store %arg10[%c32_39, %c0_40], %60 {strides = array<i32>} : memref<256x384xf32, #tpu.memory_space<vmem>>, vector<16x384xf32>,
    %c1_i32_41 = arith.constant 1 : i32
    %62 = tpu.dynamic_rotate %54 by %c1_i32_41 dim 1 : vector<16x384xf32>, i32 -> vector<16x384xf32>
    %c48_42 = arith.constant 48 : index
    %c0_43 = arith.constant 0 : index
    %63 = vector.load %arg10[%c48_42, %c0_43] : memref<256x384xf32, #tpu.memory_space<vmem>>, vector<16x384xf32>
    tpu.vector_store %arg10[%c48_42, %c0_43], %62 {strides = array<i32>} : memref<256x384xf32, #tpu.memory_space<vmem>>, vector<16x384xf32>,
    %c64_44 = arith.constant 64 : index
    %c0_45 = arith.constant 0 : index
    %64 = vector.load %arg10[%c64_44, %c0_45] : memref<256x384xf32, #tpu.memory_space<vmem>>, vector<16x384xf32>
    tpu.vector_store %arg10[%c64_44, %c0_45], %54 {strides = array<i32>} : memref<256x384xf32, #tpu.memory_space<vmem>>, vector<16x384xf32>,
    %c383_i32_46 = arith.constant 383 : i32
    %65 = tpu.dynamic_rotate %54 by %c383_i32_46 dim 1 : vector<16x384xf32>, i32 -> vector<16x384xf32>
    %c80_47 = arith.constant 80 : index
    %c0_48 = arith.constant 0 : index
    %66 = vector.load %arg10[%c80_47, %c0_48] : memref<256x384xf32, #tpu.memory_space<vmem>>, vector<16x384xf32>
    tpu.vector_store %arg10[%c80_47, %c0_48], %65 {strides = array<i32>} : memref<256x384xf32, #tpu.memory_space<vmem>>, vector<16x384xf32>,
    %c367_i32_49 = arith.constant 367 : i32
    %67 = tpu.dynamic_rotate %54 by %c367_i32_49 dim 1 : vector<16x384xf32>, i32 -> vector<16x384xf32>
    %c96_50 = arith.constant 96 : index
    %c0_51 = arith.constant 0 : index
    %68 = vector.load %arg10[%c96_50, %c0_51] : memref<256x384xf32, #tpu.memory_space<vmem>>, vector<16x384xf32>
    tpu.vector_store %arg10[%c96_50, %c0_51], %67 {strides = array<i32>} : memref<256x384xf32, #tpu.memory_space<vmem>>, vector<16x384xf32>,
    %c366_i32_52 = arith.constant 366 : i32
    %69 = tpu.dynamic_rotate %54 by %c366_i32_52 dim 1 : vector<16x384xf32>, i32 -> vector<16x384xf32>
    %c112_53 = arith.constant 112 : index
    %c0_54 = arith.constant 0 : index
    %70 = vector.load %arg10[%c112_53, %c0_54] : memref<256x384xf32, #tpu.memory_space<vmem>>, vector<16x384xf32>
    tpu.vector_store %arg10[%c112_53, %c0_54], %69 {strides = array<i32>} : memref<256x384xf32, #tpu.memory_space<vmem>>, vector<16x384xf32>,
    %c365_i32_55 = arith.constant 365 : i32
    %71 = tpu.dynamic_rotate %54 by %c365_i32_55 dim 1 : vector<16x384xf32>, i32 -> vector<16x384xf32>
    %c128_56 = arith.constant 128 : index
    %c0_57 = arith.constant 0 : index
    %72 = vector.load %arg10[%c128_56, %c0_57] : memref<256x384xf32, #tpu.memory_space<vmem>>, vector<16x384xf32>
    tpu.vector_store %arg10[%c128_56, %c0_57], %71 {strides = array<i32>} : memref<256x384xf32, #tpu.memory_space<vmem>>, vector<16x384xf32>,
    %c0_58 = arith.constant 0 : index
    %c0_59 = arith.constant 0 : index
    %73 = vector.load %arg10[%c0_58, %c0_59] : memref<256x384xf32, #tpu.memory_space<vmem>>, vector<256x384xf32>
    %cst_60 = arith.constant dense<0.000000e+00> : vector<16x384xf32>
    %74 = tpu.matmul %55, %73, %cst_60 {dimension_numbers = #tpu.dot_dimension_numbers<[1], [0], [0], [1], [0, 0, 1, 1], [], []>} : vector<16x256xf32>, vector<256x384xf32>, vector<16x384xf32> -> vector<16x384xf32>
    %c0_61 = arith.constant 0 : index
    %c0_62 = arith.constant 0 : index
    %75 = vector.load %arg7[%c0_61, %c0_62] : memref<16x1xf32, #tpu.memory_space<vmem>>, vector<16x1xf32>
    %c0_63 = arith.constant 0 : index
    %c0_64 = arith.constant 0 : index
    %76 = vector.load %arg8[%c0_63, %c0_64] : memref<16x1xf32, #tpu.memory_space<vmem>>, vector<16x1xf32>
    %77 = vector.broadcast %2 : vector<1x384xf32> to vector<16x384xf32>
    %78 = arith.mulf %74, %77 : vector<16x384xf32>
    %cst_65 = arith.constant dense<0.000000e+00> : vector<16xf32>
    %79 = vector.multi_reduction <add>, %78, %cst_65 [1] : vector<16x384xf32> to vector<16xf32>
    %80 = vector.shape_cast %79 : vector<16xf32> to vector<16x1xf32>
    %cst_66 = arith.constant 3.906250e-03 : f32
    %81 = vector.broadcast %cst_66 : f32 to vector<16x1xf32>
    %82 = arith.mulf %80, %81 : vector<16x1xf32>
    %83 = vector.broadcast %82 : vector<16x1xf32> to vector<16x384xf32>
    %84 = arith.subf %74, %83 : vector<16x384xf32>
    %85 = vector.broadcast %2 : vector<1x384xf32> to vector<16x384xf32>
    %86 = arith.mulf %84, %85 : vector<16x384xf32>
    %87 = arith.mulf %86, %86 : vector<16x384xf32>
    %cst_67 = arith.constant dense<0.000000e+00> : vector<16xf32>
    %88 = vector.multi_reduction <add>, %87, %cst_67 [1] : vector<16x384xf32> to vector<16xf32>
    %89 = vector.shape_cast %88 : vector<16xf32> to vector<16x1xf32>
    %cst_68 = arith.constant 3.906250e-03 : f32
    %90 = vector.broadcast %cst_68 : f32 to vector<16x1xf32>
    %91 = arith.mulf %89, %90 : vector<16x1xf32>
    %cst_69 = arith.constant 9.99999974E-6 : f32
    %92 = vector.broadcast %cst_69 : f32 to vector<16x1xf32>
    %93 = arith.addf %91, %92 : vector<16x1xf32>
    %94 = math.rsqrt %93 : vector<16x1xf32>
    %95 = vector.broadcast %94 : vector<16x1xf32> to vector<16x384xf32>
    %96 = arith.mulf %86, %95 : vector<16x384xf32>
    %97 = vector.broadcast %75 : vector<16x1xf32> to vector<16x384xf32>
    %98 = arith.mulf %96, %97 : vector<16x384xf32>
    %99 = vector.broadcast %76 : vector<16x1xf32> to vector<16x384xf32>
    %100 = arith.addf %98, %99 : vector<16x384xf32>
    %101 = arith.addf %1, %100 : vector<16x384xf32>
    %c0_70 = arith.constant 0 : index
    %c0_71 = arith.constant 0 : index
    %c0_72 = arith.constant 0 : index
    %102 = vector.load %arg9[%c0_70, %c0_71, %c0_72] : memref<1x16x384xf32, #tpu.memory_space<vmem>>, vector<1x16x384xf32>
    %103 = vector.shape_cast %102 : vector<1x16x384xf32> to vector<16x384xf32>
    %104 = vector.shape_cast %101 : vector<16x384xf32> to vector<1x16x384xf32>
    tpu.vector_store %arg9[%c0_70, %c0_71, %c0_72], %104 {strides = array<i32>} : memref<1x16x384xf32, #tpu.memory_space<vmem>>, vector<1x16x384xf32>,
    return
  }
  func.func @transform_0(%arg0: i32) -> (i32, i32, i32) {
    %c0_i32 = arith.constant 0 : i32
    %c0_i32_0 = arith.constant 0 : i32
    %c0_i32_1 = arith.constant 0 : i32
    return %arg0, %c0_i32, %c0_i32_0 : i32, i32, i32
  }
  func.func @transform_1(%arg0: i32) -> (i32, i32) {
    %c0_i32 = arith.constant 0 : i32
    %c0_i32_0 = arith.constant 0 : i32
    %c0_i32_1 = arith.constant 0 : i32
    return %c0_i32, %c0_i32_0 : i32, i32
  }
  func.func @transform_2(%arg0: i32) -> (i32, i32) {
    %c0_i32 = arith.constant 0 : i32
    %c0_i32_0 = arith.constant 0 : i32
    %c0_i32_1 = arith.constant 0 : i32
    return %c0_i32, %c0_i32_0 : i32, i32
  }
  func.func @transform_3(%arg0: i32) -> (i32, i32) {
    %c0_i32 = arith.constant 0 : i32
    %c0_i32_0 = arith.constant 0 : i32
    %c0_i32_1 = arith.constant 0 : i32
    return %c0_i32, %c0_i32_0 : i32, i32
  }
  func.func @transform_4(%arg0: i32) -> (i32, i32) {
    %c0_i32 = arith.constant 0 : i32
    %c0_i32_0 = arith.constant 0 : i32
    %c0_i32_1 = arith.constant 0 : i32
    return %c0_i32, %c0_i32_0 : i32, i32
  }
  func.func @transform_5(%arg0: i32) -> (i32, i32) {
    %c0_i32 = arith.constant 0 : i32
    %c0_i32_0 = arith.constant 0 : i32
    %c0_i32_1 = arith.constant 0 : i32
    return %c0_i32, %c0_i32_0 : i32, i32
  }
  func.func @transform_6(%arg0: i32) -> (i32, i32) {
    %c0_i32 = arith.constant 0 : i32
    %c0_i32_0 = arith.constant 0 : i32
    %c0_i32_1 = arith.constant 0 : i32
    return %c0_i32, %c0_i32_0 : i32, i32
  }
  func.func @transform_7(%arg0: i32) -> (i32, i32) {
    %c0_i32 = arith.constant 0 : i32
    %c0_i32_0 = arith.constant 0 : i32
    %c0_i32_1 = arith.constant 0 : i32
    return %c0_i32, %c0_i32_0 : i32, i32
  }
  func.func @transform_8(%arg0: i32) -> (i32, i32, i32) {
    %c0_i32 = arith.constant 0 : i32
    %c0_i32_0 = arith.constant 0 : i32
    %c0_i32_1 = arith.constant 0 : i32
    return %arg0, %c0_i32, %c0_i32_0 : i32, i32, i32
  }
}

</mosaic_0001>

<bundles_post_ra>
// kernel: residual_block_forward.1
= control target key start
LH: loop header
LB: loop body
LE: loop exit
PB: predicated region body
PF: predicated region fallthrough
CT: control target
= control target key end

     0   :  { %s1647_s27 = smov 0   ;;  %s2333_s0 = inlined_call_operand.vmem [shape: f32[2,16,384], index: 0, kind: input, shape index: {}]   ;;  %s2334_s1 = inlined_call_operand.vmem [shape: f32[1,384], index: 1, kind: input, shape index: {}]   ;;  %s2335_s2 = inlined_call_operand.vmem [shape: f32[16,256], index: 2, kind: input, shape index: {}]   ;;  %s2336_s3 = inlined_call_operand.vmem [shape: f32[16,1], index: 3, kind: input, shape index: {}]   ;;  %s2337_s4 = inlined_call_operand.vmem [shape: f32[16,1], index: 4, kind: input, shape index: {}]   ;;  %s2338_s5 = inlined_call_operand.vmem [shape: f32[16,256], index: 5, kind: input, shape index: {}]   ;;  %s2339_s6 = inlined_call_operand.vmem [shape: f32[16,1], index: 6, kind: input, shape index: {}]   ;;  %s2340_s7 = inlined_call_operand.vmem [shape: f32[16,1], index: 7, kind: input, shape index: {}]   ;;  %s2341_s8 = inlined_call_operand.vmem [shape: f32[2,16,384], index: 8, kind: output, shape index: {}]  }
   0x1 LB: > { %s1540_s28 = sadd.s32 4294967295, %s1590_s27   ;;  %p1544_p0 = scmp.ge.s32.totalorder %s1590_s27, 1  ;;  %s1590_s27 = sphi %s1647_s27, %s18_s27  }
   0x2   : > { %p262_p1 = scmp.lt.s32.totalorder %s1590_s27, 3 }
   0x4   : > { %p263_p2 = pnand %p1544_p0, %p262_p1 }
   0x5   : > { %p296_p3 = scmp.lt.s32.totalorder (!%p263_p2), %s1540_s28, 1  ;;  %s1593_s11 = smov (!%p263_p2), 110  }
   0x6   : > { %266 = sbr.rel (%p263_p2) target bundleno = 1487 (0x5cf), region = 52  ;;  %s1594_s12 = smov (!%p263_p2), 111  }
   0x7   : > { %s1595_s13 = smov (!%p263_p2), 127   ;;  %s1596_s14 = smov (!%p263_p2), 1  }
   0x8   : > { %s1597_s15 = smov (!%p263_p2), 17   ;;  %s1598_s16 = smov (!%p263_p2), 18  }
   0x9   : > { %s1599_s17 = smov (!%p263_p2), 19   ;;  %s1600_s20 = smov (!%p263_p2), 109  }
   0xb   : > { %v1592_v0 = vmov 0.0   ;;  %s2343_s28 = smov (!%p296_p3, %s1540_s28), 1  ;;  %v356_v7 = vld [vmem:[%s2335_s2 + $0x8] sm:$0xff]  ;;  %v371_v8 = vlaneseq }
   0xc   : > { %740 = vmatprep.subr.mxu1 %v1592_v0  ;;  %s1549_s29 = smul.u32 48, %s2343_s28  ;;  %727 = vmatprep.mubr.f32.mxu0 %v356_v7 }
   0xd   : > { %804 = vmatprep.mubr.f32.mxu1 %v356_v7  ;;  %v1784_v9 = vand.u32 127, %v371_v8 }
   0xe   : > { %s1664_s10 = scalar_lea.vmem %s2333_s0, %s1549_s29 }
   0xf   : > { %v1667_v1 = vld [vmem:[%s1664_s10 + $0x20] sm:$0xff]  ;;  %v1670_v2 = vld [vmem:[%s1664_s10 + $0x18] sm:$0xff]  ;;  %v1677_v3 = vld [vmem:[%s1664_s10 + $0x28] sm:$0xff]  ;;  %vm529_vm0 = vcmp.lt.s32.totalorder %v1784_v9, 110  ;;  %vm504_vm1 = vcmp.lt.s32.totalorder %v1784_v9, 111  ;;  %vm479_vm2 = vcmp.lt.s32.totalorder %v1784_v9, 127 }
  0x10   : > { %523 = vrot.lane.b32.xlu0 %v1667_v1, %s1593_s11  ;;  %519 = vrot.lane.b32.xlu1 %v1670_v2, %s1593_s11  ;;  %v1680_v4 = vld [vmem:[%s1664_s10 + $0x8] sm:$0xff]  ;;  %v1687_v5 = vld [vmem:[%s1664_s10 + $0x10] sm:$0xff]  ;;  %vm448_vm3 = vcmp.lt.s32.totalorder %v1784_v9, 1  ;;  %vm423_vm4 = vcmp.lt.s32.totalorder %v1784_v9, 17  ;;  %vm398_vm5 = vcmp.lt.s32.totalorder %v1784_v9, 18  ;;  %vm373_vm6 = vcmp.lt.s32.totalorder %v1784_v9, 19 }
  0x11   : > { %v1690_v6 = vld [vmem:[%s1664_s10] sm:$0xff]  ;;  %vm554_vm7 = vcmp.lt.s32.totalorder %v1784_v9, 109 }
  0x14   : > { %527 = vrot.lane.b32.xlu0 %v1677_v3, %s1593_s11  ;;  %521 = vrot.lane.b32.xlu1 %v1680_v4, %s1593_s11 }
  0x18   : > { %525 = vrot.lane.b32.xlu0 %v1687_v5, %s1593_s11  ;;  %517 = vrot.lane.b32.xlu1 %v1690_v6, %s1593_s11 }
  0x1c   : > { %498 = vrot.lane.b32.xlu0 %v1667_v1, %s1594_s12  ;;  %502 = vrot.lane.b32.xlu1 %v1677_v3, %s1594_s12 }
  0x20   : > { %494 = vrot.lane.b32.xlu0 %v1670_v2, %s1594_s12  ;;  %496 = vrot.lane.b32.xlu1 %v1680_v4, %s1594_s12 }
  0x24   : > { %500 = vrot.lane.b32.xlu0 %v1687_v5, %s1594_s12  ;;  %492 = vrot.lane.b32.xlu1 %v1690_v6, %s1594_s12 }
  0x28   : > { %473 = vrot.lane.b32.xlu0 %v1667_v1, %s1595_s13  ;;  %477 = vrot.lane.b32.xlu1 %v1677_v3, %s1595_s13 }
  0x2c   : > { %469 = vrot.lane.b32.xlu0 %v1670_v2, %s1595_s13  ;;  %471 = vrot.lane.b32.xlu1 %v1680_v4, %s1595_s13 }
  0x30   : > { %475 = vrot.lane.b32.xlu0 %v1687_v5, %s1595_s13  ;;  %467 = vrot.lane.b32.xlu1 %v1690_v6, %s1595_s13 }
  0x34   : > { %438 = vrot.lane.b32.xlu0 %v1670_v2, %s1596_s14  ;;  %442 = vrot.lane.b32.xlu1 %v1667_v1, %s1596_s14 }
  0x38   : > { %446 = vrot.lane.b32.xlu0 %v1677_v3, %s1596_s14  ;;  %436 = vrot.lane.b32.xlu1 %v1690_v6, %s1596_s14 }
  0x3c   : > { %440 = vrot.lane.b32.xlu0 %v1680_v4, %s1596_s14  ;;  %444 = vrot.lane.b32.xlu1 %v1687_v5, %s1596_s14 }
  0x40   : > { %413 = vrot.lane.b32.xlu0 %v1670_v2, %s1597_s15  ;;  %417 = vrot.lane.b32.xlu1 %v1667_v1, %s1597_s15 }
  0x44   : > { %421 = vrot.lane.b32.xlu0 %v1677_v3, %s1597_s15  ;;  %411 = vrot.lane.b32.xlu1 %v1690_v6, %s1597_s15 }
  0x48   : > { %415 = vrot.lane.b32.xlu0 %v1680_v4, %s1597_s15  ;;  %419 = vrot.lane.b32.xlu1 %v1687_v5, %s1597_s15 }
  0x4c   : > { %388 = vrot.lane.b32.xlu0 %v1670_v2, %s1598_s16  ;;  %392 = vrot.lane.b32.xlu1 %v1667_v1, %s1598_s16 }
  0x50   : > { %396 = vrot.lane.b32.xlu0 %v1677_v3, %s1598_s16  ;;  %386 = vrot.lane.b32.xlu1 %v1690_v6, %s1598_s16 }
  0x54   : > { %390 = vrot.lane.b32.xlu0 %v1680_v4, %s1598_s16  ;;  %394 = vrot.lane.b32.xlu1 %v1687_v5, %s1598_s16 }
  0x58   : > { %361 = vrot.lane.b32.xlu0 %v1670_v2, %s1599_s17  ;;  %365 = vrot.lane.b32.xlu1 %v1667_v1, %s1599_s17 }
  0x5c   : > { %369 = vrot.lane.b32.xlu0 %v1677_v3, %s1599_s17  ;;  %359 = vrot.lane.b32.xlu1 %v1690_v6, %s1599_s17 }
  0x60   : > { %363 = vrot.lane.b32.xlu0 %v1680_v4, %s1599_s17  ;;  %367 = vrot.lane.b32.xlu1 %v1687_v5, %s1599_s17 }
  0x64   : > { %548 = vrot.lane.b32.xlu0 %v1667_v1, %s1600_s20  ;;  %552 = vrot.lane.b32.xlu1 %v1677_v3, %s1600_s20 }
  0x68   : > { %544 = vrot.lane.b32.xlu0 %v1670_v2, %s1600_s20  ;;  %546 = vrot.lane.b32.xlu1 %v1680_v4, %s1600_s20 }
  0x6c   : > { %550 = vrot.lane.b32.xlu0 %v1687_v5, %s1600_s20  ;;  %542 = vrot.lane.b32.xlu1 %v1690_v6, %s1600_s20 }
  0x82   : > { %v524_v10 = vpop.permute.xlu0 %523  ;;  %v520_v11 = vpop.permute.xlu1 %519 }
  0x83   : > { %v533_v16 = vsel %vm529_vm0, %v520_v11, %v524_v10 }
  0x86   : > { %v528_v12 = vpop.permute.xlu0 %527  ;;  %v522_v13 = vpop.permute.xlu1 %521 }
  0x87   : > { %v531_v14 = vsel %vm529_vm0, %v524_v10, %v528_v12  ;;  %v535_v15 = vsel %vm529_vm0, %v528_v12, %v520_v11 }
  0x88   : > { %663 = vmatprep.subr.mxu0 %v531_v14  ;;  %741 = vmatpush1.msra.mxu1 %v535_v15 }
  0x89   : > { %664 = vmatpush1.msra.mxu0 %v533_v16  ;;  %742 = vmatprep.subr.mxu1 %v1592_v0 }
  0x8a   : > { %v526_v17 = vpop.permute.xlu0 %525  ;;  %v518_v18 = vpop.permute.xlu1 %517 }
  0x8b   : > { %v530_v19 = vsel %vm529_vm0, %v522_v13, %v526_v17  ;;  %v534_v20 = vsel %vm529_vm0, %v526_v17, %v518_v18  ;;  %v532_v21 = vsel %vm529_vm0, %v518_v18, %v522_v13 }
  0x8c   : > { %665 = vmatprep.subr.mxu0 %v530_v19  ;;  %743 = vmatpush1.msra.mxu1 %v534_v20 }
  0x8d   : > { %666 = vmatpush1.msra.mxu0 %v532_v21  ;;  %744 = vmatprep.subr.mxu1 %v1592_v0 }
  0x8e   : > { %v499_v22 = vpop.permute.xlu0 %498  ;;  %v503_v23 = vpop.permute.xlu1 %502 }
  0x8f   : > { %v506_v24 = vsel %vm504_vm1, %v499_v22, %v503_v23 }
  0x90   : > { %667 = vmatprep.subr.mxu0 %v506_v24 }
  0x92   : > { %v495_v25 = vpop.permute.xlu0 %494  ;;  %v497_v26 = vpop.permute.xlu1 %496 }
  0x93   : > { %v508_v27 = vsel %vm504_vm1, %v495_v25, %v499_v22  ;;  %v510_v28 = vsel %vm504_vm1, %v503_v23, %v495_v25 }
  0x94   : > { %668 = vmatpush1.msra.mxu0 %v508_v27  ;;  %745 = vmatpush1.msra.mxu1 %v510_v28 }
  0x95   : > { %746 = vmatprep.subr.mxu1 %v1592_v0 }
  0x96   : > { %v501_v29 = vpop.permute.xlu0 %500  ;;  %v493_v30 = vpop.permute.xlu1 %492 }
  0x97   : > { %v505_v31 = vsel %vm504_vm1, %v497_v26, %v501_v29  ;;  %v509_v32 = vsel %vm504_vm1, %v501_v29, %v493_v30  ;;  %v507_v33 = vsel %vm504_vm1, %v493_v30, %v497_v26 }
  0x98   : > { %669 = vmatprep.subr.mxu0 %v505_v31  ;;  %747 = vmatpush1.msra.mxu1 %v509_v32 }
  0x99   : > { %670 = vmatpush1.msra.mxu0 %v507_v33  ;;  %748 = vmatprep.subr.mxu1 %v1592_v0 }
  0x9a   : > { %v474_v34 = vpop.permute.xlu0 %473  ;;  %v478_v35 = vpop.permute.xlu1 %477 }
  0x9b   : > { %v481_v36 = vsel %vm479_vm2, %v474_v34, %v478_v35 }
  0x9c   : > { %671 = vmatprep.subr.mxu0 %v481_v36 }
  0x9e   : > { %v470_v37 = vpop.permute.xlu0 %469  ;;  %v472_v38 = vpop.permute.xlu1 %471 }
  0x9f   : > { %v483_v39 = vsel %vm479_vm2, %v470_v37, %v474_v34  ;;  %v485_v40 = vsel %vm479_vm2, %v478_v35, %v470_v37 }
  0xa0   : > { %672 = vmatpush1.msra.mxu0 %v483_v39  ;;  %749 = vmatpush1.msra.mxu1 %v485_v40 }
  0xa1   : > { %750 = vmatprep.subr.mxu1 %v1592_v0 }
  0xa2   : > { %v476_v41 = vpop.permute.xlu0 %475  ;;  %v468_v42 = vpop.permute.xlu1 %467 }
  0xa3   : > { %v480_v43 = vsel %vm479_vm2, %v472_v38, %v476_v41  ;;  %v484_v44 = vsel %vm479_vm2, %v476_v41, %v468_v42  ;;  %v482_v45 = vsel %vm479_vm2, %v468_v42, %v472_v38 }
  0xa4   : > { %673 = vmatprep.subr.mxu0 %v480_v43  ;;  %751 = vmatpush1.msra.mxu1 %v484_v44 }
  0xa5   : > { %674 = vmatpush1.msra.mxu0 %v482_v45  ;;  %752 = vmatprep.subr.mxu1 %v1592_v0  ;;  %v355_v45 = vld [vmem:[%s2335_s2] sm:$0xff] }
  0xa6   : > { %v439_v46 = vpop.permute.xlu0 %438  ;;  %675 = vmatprep.subr.mxu0 %v1667_v1  ;;  %v443_v47 = vpop.permute.xlu1 %442  ;;  %753 = vmatpush1.msra.mxu1 %v1677_v3 }
  0xa7   : > { %676 = vmatpush1.msra.mxu0 %v1670_v2  ;;  %754 = vmatprep.subr.mxu1 %v1592_v0  ;;  %v452_v48 = vsel %vm448_vm3, %v439_v46, %v443_v47 }
  0xa8   : > { %677 = vmatprep.subr.mxu0 %v1680_v4  ;;  %755 = vmatpush1.msra.mxu1 %v1687_v5 }
  0xa9   : > { %678 = vmatpush1.msra.mxu0 %v1690_v6  ;;  %756 = vmatprep.subr.mxu1 %v1592_v0 }
  0xaa   : > { %v447_v49 = vpop.permute.xlu0 %446  ;;  %679 = vmatprep.subr.mxu0 %v452_v48  ;;  %v437_v50 = vpop.permute.xlu1 %436  ;;  %v821_v48 = vshrl.u32 %v371_v8, 7 }
  0xab   : > { %v454_v51 = vsel %vm448_vm3, %v447_v49, %v439_v46  ;;  %v450_v52 = vsel %vm448_vm3, %v443_v47, %v447_v49  ;;  %v358_v46 = vld [vmem:[%s2335_s2 + $0x18] sm:$0xff]  ;;  %v357_v47 = vld [vmem:[%s2335_s2 + $0x10] sm:$0xff] }
  0xac   : > { %680 = vmatpush1.msra.mxu0 %v454_v51  ;;  %757 = vmatpush1.msra.mxu1 %v450_v52  ;;  %v822_v49 = vsub.s32 0, %v821_v48  ;;  %v830_v51 = vsub.s32 2, %v821_v48  ;;  %v312_v52 = vld [vmem:[%s2334_s1] sm:$0x7] }
  0xad   : > { %758 = vmatprep.subr.mxu1 %v1592_v0 }
  0xae   : > { %v441_v53 = vpop.permute.xlu0 %440  ;;  %v445_v54 = vpop.permute.xlu1 %444 }
  0xaf   : > { %v451_v55 = vsel %vm448_vm3, %v437_v50, %v441_v53  ;;  %v449_v56 = vsel %vm448_vm3, %v441_v53, %v445_v54  ;;  %v453_v57 = vsel %vm448_vm3, %v445_v54, %v437_v50  ;;  %v826_v50 = vsub.s32 1, %v821_v48 }
  0xb0   : > { %681 = vmatprep.subr.mxu0 %v451_v55  ;;  %759 = vmatpush1.msra.mxu1 %v449_v56  ;;  %v1927_v53 = vrot.slane %v312_v52, %v822_v49  ;;  %v1931_v56 = vrot.slane %v312_v52, %v830_v51 }
  0xb1   : > { %682 = vmatpush1.msra.mxu0 %v453_v57  ;;  %760 = vmatprep.subr.mxu1 %v1592_v0  ;;  %v1929_v54 = vrot.slane %v312_v52, %v826_v50 }
  0xb2   : > { %v414_v58 = vpop.permute.xlu0 %413  ;;  %v418_v59 = vpop.permute.xlu1 %417 }
  0xb3   : > { %v427_v60 = vsel %vm423_vm4, %v414_v58, %v418_v59 }
  0xb4   : > { %683 = vmatprep.subr.mxu0 %v427_v60 }
  0xb6   : > { %v422_v61 = vpop.permute.xlu0 %421  ;;  %v412_v62 = vpop.permute.xlu1 %411 }
  0xb7   : > { %v429_v63 = vsel %vm423_vm4, %v422_v61, %v414_v58  ;;  %v425_v1 = vsel %vm423_vm4, %v418_v59, %v422_v61 }
  0xb8   : > { %684 = vmatpush1.msra.mxu0 %v429_v63  ;;  %761 = vmatpush1.msra.mxu1 %v425_v1 }
  0xb9   : > { %762 = vmatprep.subr.mxu1 %v1592_v0 }
  0xba   : > { %v416_v2 = vpop.permute.xlu0 %415  ;;  %v420_v3 = vpop.permute.xlu1 %419 }
  0xbb   : > { %v426_v4 = vsel %vm423_vm4, %v412_v62, %v416_v2  ;;  %v424_v5 = vsel %vm423_vm4, %v416_v2, %v420_v3  ;;  %v428_v6 = vsel %vm423_vm4, %v420_v3, %v412_v62 }
  0xbc   : > { %685 = vmatprep.subr.mxu0 %v426_v4  ;;  %763 = vmatpush1.msra.mxu1 %v424_v5 }
  0xbd   : > { %686 = vmatpush1.msra.mxu0 %v428_v6  ;;  %764 = vmatprep.subr.mxu1 %v1592_v0 }
  0xbe   : > { %v389_v7 = vpop.permute.xlu0 %388  ;;  %v393_v10 = vpop.permute.xlu1 %392 }
  0xbf   : > { %v402_v11 = vsel %vm398_vm5, %v389_v7, %v393_v10 }
  0xc0   : > { %687 = vmatprep.subr.mxu0 %v402_v11 }
  0xc2   : > { %v397_v12 = vpop.permute.xlu0 %396  ;;  %v387_v13 = vpop.permute.xlu1 %386 }
  0xc3   : > { %v404_v14 = vsel %vm398_vm5, %v397_v12, %v389_v7  ;;  %v400_v15 = vsel %vm398_vm5, %v393_v10, %v397_v12  ;;  %v816_v12 = vld [vmem:[%s2336_s3 + $0x8] sm:$0xff] }
  0xc4   : > { %688 = vmatpush1.msra.mxu0 %v404_v14  ;;  %765 = vmatpush1.msra.mxu1 %v400_v15  ;;  %v818_v14 = vld [vmem:[%s2337_s4 + $0x8] sm:$0xff]  ;;  %v817_v15 = vld [vmem:[%s2337_s4] sm:$0xff] }
  0xc5   : > { %766 = vmatprep.subr.mxu1 %v1592_v0 }
  0xc6   : > { %v391_v16 = vpop.permute.xlu0 %390  ;;  %v395_v17 = vpop.permute.xlu1 %394 }
  0xc7   : > { %v401_v18 = vsel %vm398_vm5, %v387_v13, %v391_v16  ;;  %v399_v19 = vsel %vm398_vm5, %v391_v16, %v395_v17  ;;  %v403_v20 = vsel %vm398_vm5, %v395_v17, %v387_v13  ;;  %v1601_v13 = vmov 0  }
  0xc8   : > { %689 = vmatprep.subr.mxu0 %v401_v18  ;;  %767 = vmatpush1.msra.mxu1 %v399_v19 }
  0xc9   : > { %690 = vmatpush1.msra.mxu0 %v403_v20  ;;  %768 = vmatprep.subr.mxu1 %v1592_v0 }
  0xca   : > { %v362_v21 = vpop.permute.xlu0 %361  ;;  %v366_v22 = vpop.permute.xlu1 %365  ;;  %1568 = vset.pattern.permute.xlu1 %v1601_v13  ;;  %1569 = vset.pattern.permute.xlu0 %v1601_v13 }
  0xcb   : > { %v377_v23 = vsel %vm373_vm6, %v362_v21, %v366_v22 }
  0xcc   : > { %691 = vmatprep.subr.mxu0 %v377_v23 }
  0xce   : > { %v370_v24 = vpop.permute.xlu0 %369  ;;  %v360_v25 = vpop.permute.xlu1 %359 }
  0xcf   : > { %v379_v26 = vsel %vm373_vm6, %v370_v24, %v362_v21  ;;  %v375_v27 = vsel %vm373_vm6, %v366_v22, %v370_v24 }
  0xd0   : > { %692 = vmatpush1.msra.mxu0 %v379_v26  ;;  %769 = vmatpush1.msra.mxu1 %v375_v27 }
  0xd1   : > { %770 = vmatprep.subr.mxu1 %v1592_v0 }
  0xd2   : > { %v364_v28 = vpop.permute.xlu0 %363  ;;  %v368_v29 = vpop.permute.xlu1 %367 }
  0xd3   : > { %v376_v30 = vsel %vm373_vm6, %v360_v25, %v364_v28  ;;  %v374_v31 = vsel %vm373_vm6, %v364_v28, %v368_v29  ;;  %v378_v32 = vsel %vm373_vm6, %v368_v29, %v360_v25 }
  0xd4   : > { %693 = vmatprep.subr.mxu0 %v376_v30  ;;  %771 = vmatpush1.msra.mxu1 %v374_v31 }
  0xd5   : > { %694 = vmatpush1.msra.mxu0 %v378_v32  ;;  %800 = vmatprep.subr.mxu1 %v1592_v0 }
  0xd6   : > { %v549_v33 = vpop.permute.xlu0 %548  ;;  %v553_v34 = vpop.permute.xlu1 %552 }
  0xd7   : > { %v556_v35 = vsel %vm554_vm7, %v549_v33, %v553_v34 }
  0xd8   : > { %723 = vmatprep.subr.mxu0 %v556_v35 }
  0xda   : > { %v545_v36 = vpop.permute.xlu0 %544  ;;  %v547_v37 = vpop.permute.xlu1 %546 }
  0xdb   : > { %v558_v38 = vsel %vm554_vm7, %v545_v36, %v549_v33  ;;  %v560_v39 = vsel %vm554_vm7, %v553_v34, %v545_v36 }
  0xdc   : > { %724 = vmatpush2.msra.mxu0 %v558_v38  ;;  %801 = vmatpush2.msra.mxu1 %v560_v39 }
  0xdd   : > { %802 = vmatprep.subr.mxu1 %v1592_v0 }
  0xde   : > { %v551_v40 = vpop.permute.xlu0 %550  ;;  %v543_v41 = vpop.permute.xlu1 %542 }
  0xdf   : > { %v555_v42 = vsel %vm554_vm7, %v547_v37, %v551_v40  ;;  %v559_v43 = vsel %vm554_vm7, %v551_v40, %v543_v41  ;;  %v557_v44 = vsel %vm554_vm7, %v543_v41, %v547_v37 }
  0xe0   : > { %725 = vmatprep.subr.mxu0 %v555_v42  ;;  %803 = vmatpush2.msra.mxu1 %v559_v43  ;;  %v815_v42 = vld [vmem:[%s2336_s3] sm:$0xff] }
  0xe1   : > { %726 = vmatpush2.msra.mxu0 %v557_v44  ;;  %805 = vmatmul.mubr.f32.vlgmr.msra.gmra.mxu1 %v355_v45 }
  0xe2   : > { %728 = vmatmul.mubr.f32.vlgmr.msra.gmra.mxu0 %v355_v45  ;;  %809 = vmatprep.mubr.f32.mxu1 %v358_v46 }
  0xe3   : > { %733 = vmatprep.mubr.f32.mxu0 %v358_v46  ;;  %1308 = vmatprep.subr.mxu1 %v1592_v0 }
  0xe5   : > { %810 = vmatmul.mubr.f32.gmra.mxu1 %v357_v47 }
  0xe6   : > { %734 = vmatmul.mubr.f32.gmra.mxu0 %v357_v47 }
 0x1a1   : > { %v806_v55 = vpop.f32.mrf.mxu1 }
 0x1a2   : > { %v729_v57 = vpop.f32.mrf.mxu0  ;;  %v837_v61 = vmul.f32 %v1931_v56, %v806_v55 }
 0x1a3   : > { %v808_v58 = vpop.f32.mrf.mxu1  ;;  %v835_v60 = vmul.f32 %v1927_v53, %v729_v57 }
 0x1a4   : > { %v731_v59 = vpop.f32.mrf.mxu0 }
 0x1a5   : > { %v836_v8 = vmul.f32 %v1929_v54, %v731_v59  ;;  %v811_v62 = vpop.f32.mrf.mxu1 }
 0x1a6   : > { %v735_v63 = vpop.f32.mrf.mxu0  ;;  %v840_v6 = vmul.f32 %v1931_v56, %v811_v62 }
 0x1a7   : > { %v838_v1 = vmul.f32 %v1927_v53, %v735_v63  ;;  %v841_v2 = vadd.f32 %v836_v8, %v835_v60  ;;  %v813_v3 = vpop.f32.mrf.mxu1 }
 0x1a8   : > { %v737_v4 = vpop.f32.mrf.mxu0 }
 0x1a9   : > { %v839_v5 = vmul.f32 %v1929_v54, %v737_v4  ;;  %v842_v7 = vadd.f32 %v841_v2, %v837_v61 }
 0x1ab   : > { %843 = vadd.xlane.f32.xlu1 %v842_v7  ;;  %v845_v10 = vadd.f32 %v839_v5, %v838_v1 }
 0x1ad   : > { %v846_v11 = vadd.f32 %v845_v10, %v840_v6 }
 0x1af   : > { %847 = vadd.xlane.f32.xlu0 %v846_v11 }
 0x1bc   : > { %896 = vperm.xlu1 %1568, %v816_v12  }
 0x1c0   : > { %912 = vperm.xlu1 %1568, %v818_v14  }
 0x1c4   : > { %907 = vperm.xlu1 %1568, %v817_v15  }
 0x234   : > { %v844_v16 = vpop.xlane.xlu1 %843 }
 0x235   : > { %v849_v17 = vmul.f32 0.00390625, %v844_v16 }
 0x237   : > { %v851_v18 = vsub.f32 %v729_v57, %v849_v17  ;;  %v852_v19 = vsub.f32 %v731_v59, %v849_v17  ;;  %v853_v20 = vsub.f32 %v806_v55, %v849_v17 }
 0x238   : > { %v848_v21 = vpop.xlane.xlu0 %847  ;;  %v897_v47 = vpop.permute.xlu1 %896 }
 0x239   : > { %v857_v22 = vmul.f32 %v851_v18, %v1927_v53  ;;  %v858_v23 = vmul.f32 %v852_v19, %v1929_v54  ;;  %v850_v24 = vmul.f32 0.00390625, %v848_v21  ;;  %v859_v25 = vmul.f32 %v853_v20, %v1931_v56 }
 0x23b   : > { %v854_v26 = vsub.f32 %v735_v63, %v850_v24  ;;  %v855_v27 = vsub.f32 %v737_v4, %v850_v24  ;;  %v856_v28 = vsub.f32 %v811_v62, %v850_v24  ;;  %v863_v29 = vmul.f32 %v857_v22, %v857_v22 }
 0x23c   : > { %v864_v30 = vmul.f32 %v858_v23, %v858_v23  ;;  %v865_v34 = vmul.f32 %v859_v25, %v859_v25  ;;  %v913_v50 = vpop.permute.xlu1 %912 }
 0x23d   : > { %v860_v31 = vmul.f32 %v854_v26, %v1927_v53  ;;  %v861_v32 = vmul.f32 %v855_v27, %v1929_v54  ;;  %v1954_v33 = vmul.f32 %v856_v28, %v1931_v56  ;;  %v934_v26 = vld [vmem:[%s2338_s5 + $0x8] sm:$0xff] }
 0x23e   : > { %v869_v35 = vadd.f32 %v864_v30, %v863_v29  ;;  %1295 = vmatprep.mubr.f32.mxu0 %v934_v26  ;;  %1372 = vmatprep.mubr.f32.mxu1 %v934_v26 }
 0x23f   : > { %v866_v36 = vmul.f32 %v860_v31, %v860_v31  ;;  %v867_v37 = vmul.f32 %v861_v32, %v861_v32  ;;  %v868_v39 = vmul.f32 %v1954_v33, %v1954_v33 }
 0x240   : > { %v870_v38 = vadd.f32 %v869_v35, %v865_v34  ;;  %v908_v8 = vpop.permute.xlu1 %907 }
 0x241   : > { %v873_v40 = vadd.f32 %v867_v37, %v866_v36 }
 0x242   : > { %871 = vadd.xlane.f32.xlu0 %v870_v38 }
 0x243   : > { %v874_v41 = vadd.f32 %v873_v40, %v868_v39 }
 0x246   : > { %875 = vadd.xlane.f32.xlu0 %v874_v41 }
 0x25c   : > { %891 = vperm.xlu0 %1569, %v815_v42  }
 0x2cb   : > { %v872_v43 = vpop.xlane.xlu0 %871 }
 0x2cc   : > { %v877_v44 = vmul.f32 0.00390625, %v872_v43 }
 0x2ce   : > { %v879_v45 = vadd.f32 1e-05, %v877_v44 }
 0x2cf   : > { %v876_v46 = vpop.xlane.xlu0 %875 }
 0x2d0   : > { %1570 = vrsqrt.f32 %v879_v45  ;;  %v878_v48 = vmul.f32 0.00390625, %v876_v46 }
 0x2d2   : > { %v880_v49 = vadd.f32 1e-05, %v878_v48 }
 0x2d4   : > { %1572 = vrsqrt.f32 %v880_v49 }
 0x2d7   : > { %v892_v52 = vpop.permute.xlu0 %891 }
 0x2dd   : > { %v1571_v51 = vpop.eup %1570 }
 0x2de   : > { %v884_v55 = vmul.f32 %v1571_v51, %v858_v23  ;;  %v885_v57 = vmul.f32 %v1571_v51, %v859_v25  ;;  %v883_v58 = vmul.f32 %v1571_v51, %v857_v22 }
 0x2e0   : > { %v900_v59 = vmul.f32 %v892_v52, %v884_v55  ;;  %v901_v60 = vmul.f32 %v892_v52, %v885_v57  ;;  %v899_v61 = vmul.f32 %v892_v52, %v883_v58 }
 0x2e1   : > { %v1573_v7 = vpop.eup %1572 }
 0x2e2   : > { %v916_v62 = vadd.f32 %v908_v8, %v900_v59  ;;  %v917_v63 = vadd.f32 %v908_v8, %v901_v60  ;;  %v915_v3 = vadd.f32 %v908_v8, %v899_v61  ;;  %v887_v10 = vmul.f32 %v1573_v7, %v861_v32 }
 0x2e3   : > { %v886_v12 = vmul.f32 %v1573_v7, %v860_v31  ;;  %v888_v20 = vmul.f32 %v1573_v7, %v1954_v33 }
 0x2e4   : > { %v922_v1 = vmax.f32 %v916_v62, 0.0  ;;  %v923_v2 = vmax.f32 %v917_v63, 0.0  ;;  %v921_v6 = vmax.f32 %v915_v3, 0.0  ;;  %v903_v13 = vmul.f32 %v897_v47, %v887_v10 }
 0x2e5   : > { %v902_v14 = vmul.f32 %v897_v47, %v886_v12  ;;  %v904_v22 = vmul.f32 %v897_v47, %v888_v20 }
 0x2e6   : > { %v1962_v4 = vmul.f32 %v922_v1, %v1929_v54  ;;  %v1965_v5 = vmul.f32 %v923_v2, %v1931_v56  ;;  %v1976_v11 = vmul.f32 %v921_v6, %v1927_v53  ;;  %v919_v15 = vadd.f32 %v913_v50, %v903_v13 }
 0x2e7   : > { %v918_v16 = vadd.f32 %v913_v50, %v902_v14  ;;  %v920_v23 = vadd.f32 %v913_v50, %v904_v22 }
 0x2e8   : > { %1071 = vrot.lane.b32.xlu0 %v1965_v5, %s1594_s12  ;;  %1091 = vrot.lane.b32.xlu1 %v1962_v4, %s1593_s11  ;;  %v925_v17 = vmax.f32 %v919_v15, 0.0 }
 0x2e9   : > { %v924_v18 = vmax.f32 %v918_v16, 0.0  ;;  %v926_v24 = vmax.f32 %v920_v23, 0.0 }
 0x2ea   : > { %v1995_v19 = vmul.f32 %v925_v17, %v1929_v54 }
 0x2eb   : > { %v2003_v21 = vmul.f32 %v924_v18, %v1927_v53  ;;  %v2022_v25 = vmul.f32 %v926_v24, %v1931_v56 }
 0x2ec   : > { %1047 = vrot.lane.b32.xlu0 %v1965_v5, %s1595_s13  ;;  %1095 = vrot.lane.b32.xlu1 %v1965_v5, %s1593_s11 }
 0x2f0   : > { %1013 = vrot.lane.b32.xlu0 %v1962_v4, %s1596_s14  ;;  %1087 = vrot.lane.b32.xlu1 %v1976_v11, %s1593_s11 }
 0x2f4   : > { %989 = vrot.lane.b32.xlu0 %v1962_v4, %s1597_s15  ;;  %1067 = vrot.lane.b32.xlu1 %v1962_v4, %s1594_s12 }
 0x2f8   : > { %965 = vrot.lane.b32.xlu0 %v1962_v4, %s1598_s16  ;;  %1063 = vrot.lane.b32.xlu1 %v1976_v11, %s1594_s12 }
 0x2fc   : > { %941 = vrot.lane.b32.xlu0 %v1962_v4, %s1599_s17  ;;  %1043 = vrot.lane.b32.xlu1 %v1962_v4, %s1595_s13 }
 0x300   : > { %1069 = vrot.lane.b32.xlu0 %v1995_v19, %s1594_s12  ;;  %1039 = vrot.lane.b32.xlu1 %v1976_v11, %s1595_s13 }
 0x304   : > { %1065 = vrot.lane.b32.xlu0 %v2003_v21, %s1594_s12  ;;  %1009 = vrot.lane.b32.xlu1 %v1976_v11, %s1596_s14 }
 0x308   : > { %1045 = vrot.lane.b32.xlu0 %v1995_v19, %s1595_s13  ;;  %1017 = vrot.lane.b32.xlu1 %v1965_v5, %s1596_s14 }
 0x30c   : > { %1041 = vrot.lane.b32.xlu0 %v2003_v21, %s1595_s13  ;;  %985 = vrot.lane.b32.xlu1 %v1976_v11, %s1597_s15 }
 0x310   : > { %1011 = vrot.lane.b32.xlu0 %v2003_v21, %s1596_s14  ;;  %993 = vrot.lane.b32.xlu1 %v1965_v5, %s1597_s15 }
 0x314   : > { %1019 = vrot.lane.b32.xlu0 %v2022_v25, %s1596_s14  ;;  %961 = vrot.lane.b32.xlu1 %v1976_v11, %s1598_s16 }
 0x318   : > { %987 = vrot.lane.b32.xlu0 %v2003_v21, %s1597_s15  ;;  %969 = vrot.lane.b32.xlu1 %v1965_v5, %s1598_s16 }
 0x31c   : > { %995 = vrot.lane.b32.xlu0 %v2022_v25, %s1597_s15  ;;  %937 = vrot.lane.b32.xlu1 %v1976_v11, %s1599_s17 }
 0x320   : > { %963 = vrot.lane.b32.xlu0 %v2003_v21, %s1598_s16  ;;  %945 = vrot.lane.b32.xlu1 %v1965_v5, %s1599_s17 }
 0x324   : > { %971 = vrot.lane.b32.xlu0 %v2022_v25, %s1598_s16  ;;  %1093 = vrot.lane.b32.xlu1 %v1995_v19, %s1593_s11 }
 0x328   : > { %939 = vrot.lane.b32.xlu0 %v2003_v21, %s1599_s17  ;;  %1097 = vrot.lane.b32.xlu1 %v2022_v25, %s1593_s11 }
 0x32c   : > { %947 = vrot.lane.b32.xlu0 %v2022_v25, %s1599_s17  ;;  %1089 = vrot.lane.b32.xlu1 %v2003_v21, %s1593_s11  ;;  %s305_s11 = scalar_lea.vmem %s2341_s8, %s1549_s29 }
 0x330   : > { %1117 = vrot.lane.b32.xlu0 %v1995_v19, %s1600_s20  ;;  %1073 = vrot.lane.b32.xlu1 %v2022_v25, %s1594_s12 }
 0x334   : > { %1113 = vrot.lane.b32.xlu0 %v2003_v21, %s1600_s20  ;;  %1049 = vrot.lane.b32.xlu1 %v2022_v25, %s1595_s13 }
 0x338   : > { %1119 = vrot.lane.b32.xlu0 %v1965_v5, %s1600_s20  ;;  %1115 = vrot.lane.b32.xlu1 %v1962_v4, %s1600_s20 }
 0x33c   : > { %1015 = vrot.lane.b32.xlu1 %v1995_v19, %s1596_s14 }
 0x340   : > { %991 = vrot.lane.b32.xlu1 %v1995_v19, %s1597_s15 }
 0x344   : > { %967 = vrot.lane.b32.xlu1 %v1995_v19, %s1598_s16 }
 0x348   : > { %943 = vrot.lane.b32.xlu1 %v1995_v19, %s1599_s17 }
 0x34c   : > { %1121 = vrot.lane.b32.xlu1 %v2022_v25, %s1600_s20 }
 0x350   : > { %1111 = vrot.lane.b32.xlu1 %v1976_v11, %s1600_s20 }
 0x35a   : > { %v1072_v27 = vpop.permute.xlu0 %1071  ;;  %v1092_v28 = vpop.permute.xlu1 %1091 }
 0x35e   : > { %v2079_v29 = vpop.permute.xlu0 %1047  ;;  %v1096_v30 = vpop.permute.xlu1 %1095 }
 0x35f   : > { %v1099_v31 = vsel %vm529_vm0, %v1092_v28, %v1096_v30 }
 0x362   : > { %v2083_v32 = vpop.permute.xlu0 %1013  ;;  %v1088_v33 = vpop.permute.xlu1 %1087 }
 0x363   : > { %v1101_v6 = vsel %vm529_vm0, %v1088_v33, %v1092_v28  ;;  %v1103_v7 = vsel %vm529_vm0, %v1096_v30, %v1088_v33 }
 0x366   : > { %v2085_v34 = vpop.permute.xlu0 %989  ;;  %v1068_v35 = vpop.permute.xlu1 %1067 }
 0x367   : > { %v1075_v16 = vsel %vm504_vm1, %v1068_v35, %v1072_v27 }
 0x36a   : > { %v2087_v36 = vpop.permute.xlu0 %965  ;;  %v1064_v37 = vpop.permute.xlu1 %1063 }
 0x36b   : > { %v1079_v15 = vsel %vm504_vm1, %v1072_v27, %v1064_v37  ;;  %v1077_v17 = vsel %vm504_vm1, %v1064_v37, %v1068_v35 }
 0x36e   : > { %v2089_v38 = vpop.permute.xlu0 %941  ;;  %v2091_v39 = vpop.permute.xlu1 %1043 }
 0x36f   : > { %v1051_v27 = vsel %vm479_vm2, %v2091_v39, %v2079_v29 }
 0x372   : > { %v1070_v40 = vpop.permute.xlu0 %1069  ;;  %v1040_v41 = vpop.permute.xlu1 %1039 }
 0x373   : > { %v1055_v26 = vsel %vm479_vm2, %v2079_v29, %v1040_v41  ;;  %v1053_v28 = vsel %vm479_vm2, %v1040_v41, %v2091_v39 }
 0x376   : > { %v1066_v42 = vpop.permute.xlu0 %1065  ;;  %v2093_v43 = vpop.permute.xlu1 %1009 }
 0x377   : > { %v1078_v14 = vsel %vm504_vm1, %v1066_v42, %v1070_v40 }
 0x37a   : > { %v1046_v44 = vpop.permute.xlu0 %1045  ;;  %v2095_v45 = vpop.permute.xlu1 %1017 }
 0x37e   : > { %v1042_v46 = vpop.permute.xlu0 %1041  ;;  %v2097_v47 = vpop.permute.xlu1 %985 }
 0x37f   : > { %v1054_v24 = vsel %vm479_vm2, %v1042_v46, %v1046_v44  ;;  %v999_v41 = vsel %vm423_vm4, %v2097_v47, %v2085_v34 }
 0x382   : > { %v2099_v48 = vpop.permute.xlu0 %1011  ;;  %v2101_v49 = vpop.permute.xlu1 %993 }
 0x386   : > { %v2103_v50 = vpop.permute.xlu1 %961  ;;  %v2105_v51 = vpop.permute.xlu0 %1019 }
 0x38a   : > { %v2107_v52 = vpop.permute.xlu1 %969  ;;  %v2109_v55 = vpop.permute.xlu0 %987 }
 0x38e   : > { %v2111_v57 = vpop.permute.xlu1 %937  ;;  %v2115_v59 = vpop.permute.xlu0 %995 }
 0x38f   : > { %v1002_v39 = vsel %vm423_vm4, %v2115_v59, %v2109_v55 }
 0x392   : > { %v2113_v58 = vpop.permute.xlu1 %945  ;;  %v2117_v8 = vpop.permute.xlu0 %963 }
 0x396   : > { %v1094_v60 = vpop.permute.xlu1 %1093  ;;  %v2125_v3 = vpop.permute.xlu0 %971 }
 0x39a   : > { %v1098_v61 = vpop.permute.xlu1 %1097  ;;  %v2146_v18 = vpop.permute.xlu0 %939 }
 0x39b   : > { %v1100_v62 = vsel %vm529_vm0, %v1094_v60, %v1098_v61 }
 0x39c   : > { %1231 = vmatprep.subr.mxu0 %v1100_v62 }
 0x39e   : > { %v1090_v63 = vpop.permute.xlu1 %1089 }
 0x39f   : > { %v1102_v1 = vsel %vm529_vm0, %v1090_v63, %v1094_v60  ;;  %v1104_v2 = vsel %vm529_vm0, %v1098_v61, %v1090_v63  ;;  %v953_v60 = vsel %vm373_vm6, %v2113_v58, %v2111_v57 }
 0x3a0   : > { %1232 = vmatpush1.msra.mxu0 %v1102_v1  ;;  %1309 = vmatpush1.msra.mxu1 %v1104_v2  ;;  %v933_v1 = vld [vmem:[%s2338_s5] sm:$0xff] }
 0x3a1   : > { %1233 = vmatprep.subr.mxu0 %v1099_v31  ;;  %1310 = vmatprep.subr.mxu1 %v1592_v0  ;;  %v948_v31 = vpop.permute.xlu0 %947 }
 0x3a2   : > { %1234 = vmatpush1.msra.mxu0 %v1101_v6  ;;  %1311 = vmatpush1.msra.mxu1 %v1103_v7  ;;  %v1074_v10 = vpop.permute.xlu1 %1073  ;;  %v936_v6 = vld [vmem:[%s2338_s5 + $0x18] sm:$0xff] }
 0x3a3   : > { %v1080_v12 = vsel %vm504_vm1, %v1074_v10, %v1066_v42  ;;  %1312 = vmatprep.subr.mxu1 %v1592_v0  ;;  %v1076_v13 = vsel %vm504_vm1, %v1070_v40, %v1074_v10  ;;  %v997_v40 = vsel %vm423_vm4, %v2085_v34, %v2101_v49  ;;  %v1001_v42 = vsel %vm423_vm4, %v2101_v49, %v2097_v47 }
 0x3a4   : > { %1235 = vmatprep.subr.mxu0 %v1076_v13  ;;  %1313 = vmatpush1.msra.mxu1 %v1080_v12  ;;  %v978_v34 = vsel %vm398_vm5, %v2125_v3, %v2117_v8  ;;  %v973_v47 = vsel %vm398_vm5, %v2087_v36, %v2107_v52  ;;  %v977_v49 = vsel %vm398_vm5, %v2107_v52, %v2103_v50 }
 0x3a5   : > { %1236 = vmatpush1.msra.mxu0 %v1078_v14  ;;  %1314 = vmatprep.subr.mxu1 %v1592_v0  ;;  %v951_v52 = vsel %vm373_vm6, %v2111_v57, %v2089_v38 }
 0x3a6   : > { %1237 = vmatprep.subr.mxu0 %v1075_v16  ;;  %1315 = vmatpush1.msra.mxu1 %v1079_v15  ;;  %v1050_v20 = vpop.permute.xlu1 %1049 }
 0x3a7   : > { %v1056_v22 = vsel %vm479_vm2, %v1050_v20, %v1042_v46  ;;  %1238 = vmatpush1.msra.mxu0 %v1077_v17  ;;  %1316 = vmatprep.subr.mxu1 %v1592_v0  ;;  %v1052_v23 = vsel %vm479_vm2, %v1046_v44, %v1050_v20 }
 0x3a8   : > { %1239 = vmatprep.subr.mxu0 %v1052_v23  ;;  %1317 = vmatpush1.msra.mxu1 %v1056_v22 }
 0x3a9   : > { %1240 = vmatpush1.msra.mxu0 %v1054_v24  ;;  %1318 = vmatprep.subr.mxu1 %v1592_v0 }
 0x3aa   : > { %1241 = vmatprep.subr.mxu0 %v1051_v27  ;;  %1319 = vmatpush1.msra.mxu1 %v1055_v26  ;;  %v2166_v30 = vpop.permute.xlu1 %1115 }
 0x3ab   : > { %1242 = vmatpush1.msra.mxu0 %v1053_v28  ;;  %1320 = vmatprep.subr.mxu1 %v1592_v0 }
 0x3ac   : > { %1243 = vmatprep.subr.mxu0 %v1995_v19  ;;  %1321 = vmatpush1.msra.mxu1 %v2022_v25  ;;  %v1118_v25 = vpop.permute.xlu0 %1117 }
 0x3ad   : > { %1244 = vmatpush1.msra.mxu0 %v2003_v21  ;;  %1322 = vmatprep.subr.mxu1 %v1592_v0  ;;  %v1025_v21 = vsel %vm448_vm3, %v2095_v45, %v2093_v43 }
 0x3ae   : > { %1245 = vmatprep.subr.mxu0 %v1962_v4  ;;  %1323 = vmatpush1.msra.mxu1 %v1965_v5  ;;  %v1016_v29 = vpop.permute.xlu1 %1015  ;;  %v1026_v4 = vsel %vm448_vm3, %v2105_v51, %v2099_v48  ;;  %v1021_v5 = vsel %vm448_vm3, %v2083_v32, %v2095_v45 }
 0x3af   : > { %v1022_v33 = vsel %vm448_vm3, %v1016_v29, %v2105_v51  ;;  %1246 = vmatpush1.msra.mxu0 %v1976_v11  ;;  %1324 = vmatprep.subr.mxu1 %v1592_v0  ;;  %v1024_v19 = vsel %vm448_vm3, %v2099_v48, %v1016_v29  ;;  %v1023_v11 = vsel %vm448_vm3, %v2093_v43, %v2083_v32  ;;  %v1385_v29 = vld [vmem:[%s2340_s7] sm:$0xff] }
 0x3b0   : > { %1247 = vmatprep.subr.mxu0 %v1024_v19  ;;  %1325 = vmatpush1.msra.mxu1 %v1022_v33  ;;  %v1114_v46 = vpop.permute.xlu0 %1113  ;;  %v975_v48 = vsel %vm398_vm5, %v2103_v50, %v2087_v36  ;;  %v954_v36 = vsel %vm373_vm6, %v948_v31, %v2146_v18  ;;  %v949_v50 = vsel %vm373_vm6, %v2089_v38, %v2113_v58  ;;  %v1386_v33 = vld [vmem:[%s2340_s7 + $0x8] sm:$0xff] }
 0x3b1   : > { %1248 = vmatpush1.msra.mxu0 %v1026_v4  ;;  %1326 = vmatprep.subr.mxu1 %v1592_v0  ;;  %v1126_v38 = vsel %vm554_vm7, %v1114_v46, %v1118_v25 }
 0x3b2   : > { %1249 = vmatprep.subr.mxu0 %v1023_v11  ;;  %1327 = vmatpush1.msra.mxu1 %v1021_v5  ;;  %v992_v35 = vpop.permute.xlu1 %991 }
 0x3b3   : > { %v998_v37 = vsel %vm423_vm4, %v992_v35, %v2115_v59  ;;  %1250 = vmatpush1.msra.mxu0 %v1025_v21  ;;  %1328 = vmatprep.subr.mxu1 %v1592_v0  ;;  %v1000_v32 = vsel %vm423_vm4, %v2109_v55, %v992_v35 }
 0x3b4   : > { %1251 = vmatprep.subr.mxu0 %v1000_v32  ;;  %1329 = vmatpush1.msra.mxu1 %v998_v37 }
 0x3b5   : > { %1252 = vmatpush1.msra.mxu0 %v1002_v39  ;;  %1330 = vmatprep.subr.mxu1 %v1592_v0 }
 0x3b6   : > { %1253 = vmatprep.subr.mxu0 %v999_v41  ;;  %1331 = vmatpush1.msra.mxu1 %v997_v40  ;;  %v968_v43 = vpop.permute.xlu1 %967 }
 0x3b7   : > { %v974_v44 = vsel %vm398_vm5, %v968_v43, %v2125_v3  ;;  %1254 = vmatpush1.msra.mxu0 %v1001_v42  ;;  %1332 = vmatprep.subr.mxu1 %v1592_v0  ;;  %v976_v45 = vsel %vm398_vm5, %v2117_v8, %v968_v43  ;;  %v1120_v8 = vpop.permute.xlu0 %1119 }
 0x3b8   : > { %1255 = vmatprep.subr.mxu0 %v976_v45  ;;  %1333 = vmatpush1.msra.mxu1 %v974_v44  ;;  %v1123_v57 = vsel %vm554_vm7, %v2166_v30, %v1120_v8 }
 0x3b9   : > { %1256 = vmatpush1.msra.mxu0 %v978_v34  ;;  %1334 = vmatprep.subr.mxu1 %v1592_v0 }
 0x3ba   : > { %1257 = vmatprep.subr.mxu0 %v975_v48  ;;  %1335 = vmatpush1.msra.mxu1 %v973_v47  ;;  %v944_v51 = vpop.permute.xlu1 %943 }
 0x3bb   : > { %v950_v55 = vsel %vm373_vm6, %v944_v51, %v948_v31  ;;  %1258 = vmatpush1.msra.mxu0 %v977_v49  ;;  %1336 = vmatprep.subr.mxu1 %v1592_v0  ;;  %v952_v59 = vsel %vm373_vm6, %v2146_v18, %v944_v51  ;;  %v1383_v31 = vld [vmem:[%s2339_s6] sm:$0xff] }
 0x3bc   : > { %1259 = vmatprep.subr.mxu0 %v952_v59  ;;  %1337 = vmatpush1.msra.mxu1 %v950_v55 }
 0x3bd   : > { %1260 = vmatpush1.msra.mxu0 %v954_v36  ;;  %1338 = vmatprep.subr.mxu1 %v1592_v0 }
 0x3be   : > { %1261 = vmatprep.subr.mxu0 %v951_v52  ;;  %1339 = vmatpush1.msra.mxu1 %v949_v50  ;;  %v1122_v61 = vpop.permute.xlu1 %1121  ;;  %v1384_v52 = vld [vmem:[%s2339_s6 + $0x8] sm:$0xff] }
 0x3bf   : > { %v1128_v62 = vsel %vm554_vm7, %v1122_v61, %v1114_v46  ;;  %1262 = vmatpush1.msra.mxu0 %v953_v60  ;;  %1368 = vmatprep.subr.mxu1 %v1592_v0  ;;  %v1124_v63 = vsel %vm554_vm7, %v1118_v25, %v1122_v61 }
 0x3c0   : > { %1291 = vmatprep.subr.mxu0 %v1124_v63  ;;  %1369 = vmatpush2.msra.mxu1 %v1128_v62 }
 0x3c1   : > { %1292 = vmatpush2.msra.mxu0 %v1126_v38  ;;  %1370 = vmatprep.subr.mxu1 %v1592_v0  ;;  %v935_v0 = vld [vmem:[%s2338_s5 + $0x10] sm:$0xff] }
 0x3c2   : > { %1293 = vmatprep.subr.mxu0 %v1123_v57  ;;  %v1112_v58 = vpop.permute.xlu1 %1111 }
 0x3c3   : > { %v1125_v2 = vsel %vm554_vm7, %v1112_v58, %v2166_v30  ;;  %v1127_v3 = vsel %vm554_vm7, %v1120_v8, %v1112_v58 }
 0x3c4   : > { %1294 = vmatpush2.msra.mxu0 %v1125_v2  ;;  %1371 = vmatpush2.msra.mxu1 %v1127_v3 }
 0x3c5   : > { %1296 = vmatmul.mubr.f32.vlgmr.msra.gmra.mxu0 %v933_v1  ;;  %1373 = vmatmul.mubr.f32.vlgmr.msra.gmra.mxu1 %v933_v1 }
 0x3c6   : > { %1301 = vmatprep.mubr.f32.mxu0 %v936_v6  ;;  %1377 = vmatprep.mubr.f32.mxu1 %v936_v6 }
 0x3c9   : > { %1302 = vmatmul.mubr.f32.gmra.mxu0 %v935_v0  ;;  %1378 = vmatmul.mubr.f32.gmra.mxu1 %v935_v0 }
 0x485   : > { %v1297_v7 = vpop.f32.mrf.mxu0  ;;  %v1374_v10 = vpop.f32.mrf.mxu1 }
 0x486   : > { %v1387_v13 = vmul.f32 %v1297_v7, %v1927_v53  ;;  %v1389_v15 = vmul.f32 %v1374_v10, %v1931_v56 }
 0x487   : > { %v1299_v9 = vpop.f32.mrf.mxu0  ;;  %v1376_v12 = vpop.f32.mrf.mxu1 }
 0x488   : > { %v1388_v14 = vmul.f32 %v1299_v9, %v1929_v54 }
 0x489   : > { %v1303_v16 = vpop.f32.mrf.mxu0  ;;  %v1379_v17 = vpop.f32.mrf.mxu1 }
 0x48a   : > { %v1393_v18 = vadd.f32 %v1388_v14, %v1387_v13  ;;  %v1390_v24 = vmul.f32 %v1303_v16, %v1927_v53  ;;  %v1392_v27 = vmul.f32 %v1379_v17, %v1931_v56 }
 0x48b   : > { %v1305_v20 = vpop.f32.mrf.mxu0  ;;  %v1381_v22 = vpop.f32.mrf.mxu1 }
 0x48c   : > { %v1394_v23 = vadd.f32 %v1393_v18, %v1389_v15  ;;  %v1391_v26 = vmul.f32 %v1305_v20, %v1929_v54 }
 0x48e   : > { %v1397_v28 = vadd.f32 %v1391_v26, %v1390_v24  ;;  %1395 = vadd.xlane.f32.xlu0 %v1394_v23  ;;  %v1579_v24 = vld [vmem:[%s1664_s10 + $0x8] sm:$0xff] }
 0x490   : > { %v1398_v30 = vadd.f32 %v1397_v28, %v1392_v27  ;;  %v1580_v27 = vld [vmem:[%s1664_s10 + $0x10] sm:$0xff] }
 0x492   : > { %1399 = vadd.xlane.f32.xlu1 %v1398_v30 }
 0x4a3   : > { %1443 = vperm.xlu1 %1568, %v1383_v31  }
 0x4a7   : > { %1459 = vperm.xlu1 %1568, %v1385_v29  }
 0x4ab   : > { %1464 = vperm.xlu1 %1568, %v1386_v33   ;;  %v1581_v33 = vld [vmem:[%s1664_s10 + $0x18] sm:$0xff] }
 0x517   : > { %v1396_v19 = vpop.xlane.xlu0 %1395 }
 0x518   : > { %v1401_v4 = vmul.f32 0.00390625, %v1396_v19 }
 0x51a   : > { %v1403_v5 = vsub.f32 %v1297_v7, %v1401_v4  ;;  %v1404_v11 = vsub.f32 %v1299_v9, %v1401_v4  ;;  %v1405_v21 = vsub.f32 %v1374_v10, %v1401_v4  ;;  %v1582_v4 = vld [vmem:[%s1664_s10 + $0x20] sm:$0xff] }
 0x51b   : > { %v1400_v25 = vpop.xlane.xlu1 %1399 }
 0x51c   : > { %v1409_v35 = vmul.f32 %v1403_v5, %v1927_v53  ;;  %v1410_v37 = vmul.f32 %v1404_v11, %v1929_v54  ;;  %v1402_v32 = vmul.f32 0.00390625, %v1400_v25  ;;  %v1411_v39 = vmul.f32 %v1405_v21, %v1931_v56  ;;  %v1583_v11 = vld [vmem:[%s1664_s10 + $0x28] sm:$0xff] }
 0x51e   : > { %v1406_v40 = vsub.f32 %v1303_v16, %v1402_v32  ;;  %v1407_v41 = vsub.f32 %v1305_v20, %v1402_v32  ;;  %v1408_v42 = vsub.f32 %v1379_v17, %v1402_v32  ;;  %v1415_v43 = vmul.f32 %v1409_v35, %v1409_v35  ;;  %v1578_v20 = vld [vmem:[%s1664_s10] sm:$0xff] }
 0x51f   : > { %v1416_v44 = vmul.f32 %v1410_v37, %v1410_v37  ;;  %v1417_v47 = vmul.f32 %v1411_v39, %v1411_v39  ;;  %v1444_v62 = vpop.permute.xlu1 %1443 }
 0x520   : > { %v1412_v45 = vmul.f32 %v1406_v40, %v1927_v53  ;;  %v1413_v34 = vmul.f32 %v1407_v41, %v1929_v54  ;;  %v1414_v46 = vmul.f32 %v1408_v42, %v1931_v56 }
 0x521   : > { %v1421_v48 = vadd.f32 %v1416_v44, %v1415_v43 }
 0x522   : > { %v1418_v49 = vmul.f32 %v1412_v45, %v1412_v45  ;;  %v1419_v51 = vmul.f32 %v1413_v34, %v1413_v34  ;;  %v1420_v59 = vmul.f32 %v1414_v46, %v1414_v46 }
 0x523   : > { %v1422_v55 = vadd.f32 %v1421_v48, %v1417_v47  ;;  %v1460_v1 = vpop.permute.xlu1 %1459 }
 0x524   : > { %v1425_v36 = vadd.f32 %v1419_v51, %v1418_v49 }
 0x525   : > { %1423 = vadd.xlane.f32.xlu0 %v1422_v55 }
 0x526   : > { %v1426_v50 = vadd.f32 %v1425_v36, %v1420_v59 }
 0x527   : > { %v1465_v23 = vpop.permute.xlu1 %1464 }
 0x529   : > { %1427 = vadd.xlane.f32.xlu0 %v1426_v50 }
 0x53f   : > { %1448 = vperm.xlu0 %1569, %v1384_v52  }
 0x5ae   : > { %v1424_v53 = vpop.xlane.xlu0 %1423 }
 0x5af   : > { %v1429_v60 = vmul.f32 0.00390625, %v1424_v53 }
 0x5b1   : > { %v1431_v54 = vadd.f32 1e-05, %v1429_v60 }
 0x5b2   : > { %v1428_v8 = vpop.xlane.xlu0 %1427 }
 0x5b3   : > { %1574 = vrsqrt.f32 %v1431_v54  ;;  %v1430_v56 = vmul.f32 0.00390625, %v1428_v8 }
 0x5b5   : > { %v1432_v61 = vadd.f32 1e-05, %v1430_v56 }
 0x5b7   : > { %1576 = vrsqrt.f32 %v1432_v61 }
 0x5ba   : > { %v1449_v13 = vpop.permute.xlu0 %1448 }
 0x5c0   : > { %v1575_v63 = vpop.eup %1574 }
 0x5c1   : > { %v1435_v38 = vmul.f32 %v1575_v63, %v1409_v35  ;;  %v1436_v57 = vmul.f32 %v1575_v63, %v1410_v37  ;;  %v1437_v58 = vmul.f32 %v1575_v63, %v1411_v39 }
 0x5c3   : > { %v1451_v2 = vmul.f32 %v1444_v62, %v1435_v38  ;;  %v1452_v3 = vmul.f32 %v1444_v62, %v1436_v57  ;;  %v1453_v6 = vmul.f32 %v1444_v62, %v1437_v58 }
 0x5c4   : > { %v1577_v0 = vpop.eup %1576 }
 0x5c5   : > { %v1438_v7 = vmul.f32 %v1577_v0, %v1412_v45  ;;  %v1439_v10 = vmul.f32 %v1577_v0, %v1413_v34  ;;  %v1440_v9 = vmul.f32 %v1577_v0, %v1414_v46  ;;  %v1467_v12 = vadd.f32 %v1460_v1, %v1451_v2 }
 0x5c6   : > { %v1468_v14 = vadd.f32 %v1460_v1, %v1452_v3  ;;  %v1469_v15 = vadd.f32 %v1460_v1, %v1453_v6 }
 0x5c7   : > { %v1454_v16 = vmul.f32 %v1449_v13, %v1438_v7  ;;  %v1455_v17 = vmul.f32 %v1449_v13, %v1439_v10  ;;  %v1456_v18 = vmul.f32 %v1449_v13, %v1440_v9  ;;  %v1473_v22 = vadd.f32 %v1578_v20, %v1467_v12 }
 0x5c8   : > { %v1474_v26 = vadd.f32 %v1579_v24, %v1468_v14  ;;  %v1475_v28 = vadd.f32 %v1580_v27, %v1469_v15 }
 0x5c9   : > { %v1470_v30 = vadd.f32 %v1465_v23, %v1454_v16  ;;  %v1471_v31 = vadd.f32 %v1465_v23, %v1455_v17  ;;  %v1472_v29 = vadd.f32 %v1465_v23, %v1456_v18  ;;  %1479 = vst [vmem:[%s305_s11] sm:$0xff] %v1473_v22 }
 0x5ca   : > { %1480 = vst [vmem:[%s305_s11 + $0x8] sm:$0xff] %v1474_v26  ;;  %1481 = vst [vmem:[%s305_s11 + $0x10] sm:$0xff] %v1475_v28 }
 0x5cb   : > { %v1476_v19 = vadd.f32 %v1581_v33, %v1470_v30  ;;  %v1477_v5 = vadd.f32 %v1582_v4, %v1471_v31  ;;  %v1478_v21 = vadd.f32 %v1583_v11, %v1472_v29 }
 0x5cd   : > { %1482 = vst [vmem:[%s305_s11 + $0x18] sm:$0xff] %v1476_v19  ;;  %1483 = vst [vmem:[%s305_s11 + $0x20] sm:$0xff] %v1477_v5 }
 0x5ce   : > { %1484 = vst [vmem:[%s305_s11 + $0x28] sm:$0xff] %v1478_v21 }
 0x5cf PF: > { %s18_s27 = sadd.s32 1, %s1590_s27  }
 0x5d0   : > { %p15_p4 = scmp.ge.s32.totalorder %s18_s27, 4  }
 0x5d2   :  { %17 = sbr.rel (!%p15_p4) target bundleno = 1 (0x1), region = 82 }

</bundles_post_ra>
